<compile_context>
chip_gen: v7x
topology: tpu7x:2x2x1
jax: 0.10.0
libtpu: 0.0.40
codegen_flags: <defaults>
</compile_context>

<pallas_src>
import functools

import jax
import jax.numpy as jnp
from jax import lax
from jax.experimental import pallas as pl
from jax.experimental.pallas import tpu as pltpu

_LANES = 128
# Matches the spirit of -torch.finfo(dtype).max without risking inf-inf NaNs
# in the online-softmax update.
_MASK_VALUE = -0.7 * float(jnp.finfo(jnp.float32).max)


def _rep_lanes(x, n):
    """Broadcast a lane-replicated (rows, 128) value to (rows, n)."""
    if n == _LANES:
        return x
    if n < _LANES:
        return x[:, :n]
    if n % _LANES == 0:
        return jnp.tile(x, (1, n // _LANES))
    return jnp.broadcast_to(x[:, :1], (x.shape[0], n))


# --------------------------------------------------------------------------
# Kernel: one (batch*head, q-tile) pair, looping over kv tiles (last grid
# axis) with online softmax carried in VMEM scratch.
# --------------------------------------------------------------------------
def _attend_fwd_kernel(q_ref, k_ref, v_ref, o_ref,
                       m_sc, l_sc, acc_sc,
                       *, scale, causal, q_len, kv_len,
                       block_q, block_k, compute_dtype):
    q_idx = pl.program_id(1)
    kv_idx = pl.program_id(2)
    head_dim = acc_sc.shape[-1]

    @pl.when(kv_idx == 0)
    def _init():
        m_sc[...] = jnp.full_like(m_sc, -jnp.inf)
        l_sc[...] = jnp.zeros_like(l_sc)
        acc_sc[...] = jnp.zeros_like(acc_sc)

    def _compute():
        # Fold softmax scale into q (cheap), run matmuls in bf16, f32 acc.
        q = (q_ref[0] * scale).astype(compute_dtype)          # (bq, D)
        k = k_ref[0].astype(compute_dtype)                     # (bk, D)
        v = v_ref[0].astype(compute_dtype)                     # (bk, D)

        # Contract directly on the shared D axis (no explicit k.T transpose).
        s = lax.dot_general(q, k,
                            dimension_numbers=(((1,), (1,)), ((), ())),
                            preferred_element_type=jnp.float32)  # (bq, bk)

        if causal:
            offset = kv_len - q_len
            row = (q_idx * block_q
                   + lax.broadcasted_iota(jnp.int32, (block_q, block_k), 0))
            col = (kv_idx * block_k
                   + lax.broadcasted_iota(jnp.int32, (block_q, block_k), 1))
            # torch: triu(j - i + 1)  ->  masked where col > row + (kv_len-q_len)
            s = jnp.where(col > row + offset, _MASK_VALUE, s)

        m_prev = m_sc[...]                                     # (bq, 128)
        l_prev = l_sc[...]                                     # (bq, 128)
        m_next = jnp.maximum(m_prev, jnp.max(s, axis=-1, keepdims=True))
        alpha = jnp.exp(m_prev - m_next)                       # (bq, 128)
        p = jnp.exp(s - _rep_lanes(m_next, block_k))           # (bq, bk) f32

        l_sc[...] = alpha * l_prev + jnp.sum(p, axis=-1, keepdims=True)
        pv = jnp.dot(p.astype(compute_dtype), v,
                     preferred_element_type=jnp.float32)       # (bq, D)
        acc_sc[...] = acc_sc[...] * _rep_lanes(alpha, head_dim) + pv
        m_sc[...] = m_next

    if causal:
        # Skip kv tiles entirely above the causal diagonal (~2x for square
        # causal attention).  kv_idx == 0 always runs so rows that are fully
        # masked (degenerate kv_len < q_len case) still get finite output.
        run = jnp.logical_or(
            kv_idx == 0,
            kv_idx * block_k <= (q_idx + 1) * block_q - 1 + (kv_len - q_len))
        pl.when(run)(_compute)
    else:
        _compute()

    @pl.when(kv_idx == pl.num_programs(2) - 1)
    def _finalize():
        inv_l = pl.reciprocal(l_sc[...], approx=False)   # exact; once per tile
        o_ref[0] = (acc_sc[...] * _rep_lanes(inv_l, head_dim)).astype(o_ref.dtype)


def _pick_block(dim, prefs=(256, 128, 512)):
    """Largest vreg/VMEM-friendly tile that divides `dim` (or full extent)."""
    for cand in prefs:
        if dim % cand == 0:
            return cand
    return dim   # full extent is always a legal block size


# --------------------------------------------------------------------------
# Wrapper.
# --------------------------------------------------------------------------
def attend_forward(q, k, v, *, scale=None, causal=False,
                   block_q=None, block_k=None,
                   compute_dtype=jnp.bfloat16):
    """q: (B, H, N, D); k, v: (B, H, M, D). Returns (B, H, N, D)."""
    B, H, N, D = q.shape
    Bk, Hk, M, Dk = k.shape
    assert (B, H, D) == (Bk, Hk, Dk), "non-flash path requires matching heads"
    assert v.shape == k.shape

    scale = float(D) ** -0.5 if scale is None else float(scale)

    # Flatten batch*heads -> independent parallel grid steps (megacore).
    qf = q.reshape(B * H, N, D)
    kf = k.reshape(B * H, M, D)
    vf = v.reshape(B * H, M, D)

    # Pad head_dim to a multiple of 128 lanes: lane-dense output stores and a
    # full-width PV matmul.  Zero columns contribute nothing to QK^T or PV.
    Dp = max(_LANES, ((D + _LANES - 1) // _LANES) * _LANES)
    if Dp != D:
        pad = ((0, 0), (0, 0), (0, Dp - D))
        qf, kf, vf = jnp.pad(qf, pad), jnp.pad(kf, pad), jnp.pad(vf, pad)

    bq = _pick_block(N) if block_q is None else block_q
    bk = _pick_block(M) if block_k is None else block_k
    assert N % bq == 0 and M % bk == 0

    grid = (B * H, N // bq, M // bk)   # kv (reduction) axis last

    kernel = functools.partial(
        _attend_fwd_kernel, scale=scale, causal=causal,
        q_len=N, kv_len=M, block_q=bq, block_k=bk,
        compute_dtype=compute_dtype)

    out = pl.pallas_call(
        kernel,
        out_shape=jax.ShapeDtypeStruct((B * H, N, Dp), q.dtype),
        grid_spec=pltpu.PrefetchScalarGridSpec(
            num_scalar_prefetch=0,
            grid=grid,
            in_specs=[
                pl.BlockSpec((1, bq, Dp), lambda bh, qi, ki: (bh, qi, 0)),
                pl.BlockSpec((1, bk, Dp), lambda bh, qi, ki: (bh, ki, 0)),
                pl.BlockSpec((1, bk, Dp), lambda bh, qi, ki: (bh, ki, 0)),
            ],
            out_specs=pl.BlockSpec((1, bq, Dp), lambda bh, qi, ki: (bh, qi, 0)),
            scratch_shapes=[
                pltpu.VMEM((bq, _LANES), jnp.float32),  # running max (lane-dense)
                pltpu.VMEM((bq, _LANES), jnp.float32),  # running denom
                pltpu.VMEM((bq, Dp), jnp.float32),      # output accumulator
            ],
        ),
        compiler_params=pltpu.CompilerParams(
            dimension_semantics=("parallel", "parallel", "arbitrary")),
    )(qf, kf, vf)

    out = out.reshape(B, H, N, Dp)
    return out[..., :D] if Dp != D else out


# --------------------------------------------------------------------------
# Pure-JAX reference (correctness check only).
# --------------------------------------------------------------------------
def _attend_ref(q, k, v, *, scale=None, causal=False):
    scale = q.shape[-1] ** -0.5 if scale is None else scale
    sim = jnp.einsum('bhid,bhjd->bhij', q, k) * scale
    if causal:
        i, j = sim.shape[-2:]
        mask = jnp.triu(jnp.ones((i, j), dtype=bool), k=j - i + 1)
        sim = jnp.where(mask, -jnp.finfo(sim.dtype).max, sim)
    attn = jax.nn.softmax(sim, axis=-1)
    return jnp.einsum('bhij,bhjd->bhid', attn, v)


if __name__ == "__main__":
    key = jax.random.PRNGKey(0)

    # Small shape matching the module (B, H, N, D) / (B, H, M, D).
    B, H, N, M, D = 2, 4, 16, 16, 32
    kq, kk, kv = jax.random.split(key, 3)
    q = jax.random.normal(kq, (B, H, N, D), dtype=jnp.float32)
    k = jax.random.normal(kk, (B, H, M, D), dtype=jnp.float32)
    v = jax.random.normal(kv, (B, H, M, D), dtype=jnp.float32)

    # Non-causal (default Attend config).  Tolerance accounts for bf16 matmuls.
    out = jax.block_until_ready(attend_forward(q, k, v))
    ref = _attend_ref(q, k, v)
    assert jnp.allclose(out, ref, atol=2e-2, rtol=2e-2), \
        float(jnp.max(jnp.abs(out - ref)))

    # Causal path.
    out_c = jax.block_until_ready(attend_forward(q, k, v, causal=True))
    ref_c = _attend_ref(q, k, v, causal=True)
    assert jnp.allclose(out_c, ref_c, atol=2e-2, rtol=2e-2), \
        float(jnp.max(jnp.abs(out_c - ref_c)))

    # Multi-tile causal case (exercises online softmax across kv tiles and
    # the above-diagonal tile skipping).
    B2, H2, N2, D2 = 1, 2, 384, 64
    kq2, kk2, kv2 = jax.random.split(jax.random.PRNGKey(1), 3)
    q2 = jax.random.normal(kq2, (B2, H2, N2, D2), dtype=jnp.float32)
    k2 = jax.random.normal(kk2, (B2, H2, N2, D2), dtype=jnp.float32)
    v2 = jax.random.normal(kv2, (B2, H2, N2, D2), dtype=jnp.float32)
    out2 = jax.block_until_ready(attend_forward(q2, k2, v2, causal=True))
    ref2 = _attend_ref(q2, k2, v2, causal=True)
    assert jnp.allclose(out2, ref2, atol=2e-2, rtol=2e-2), \
        float(jnp.max(jnp.abs(out2 - ref2)))

    print("KERNEL_OK")
</pallas_src>

<mosaic_0001>
module attributes {stable_mosaic.version = 11 : i64} {
  func.func @_attend_fwd_kernel(%arg0: i32, %arg1: i32, %arg2: i32, %arg3: memref<1x16x128xf32, #tpu.memory_space<vmem>>, %arg4: memref<1x16x128xf32, #tpu.memory_space<vmem>>, %arg5: memref<1x16x128xf32, #tpu.memory_space<vmem>>, %arg6: memref<1x16x128xf32, #tpu.memory_space<vmem>>, %arg7: memref<16x128xf32, #tpu.memory_space<vmem>>, %arg8: memref<16x128xf32, #tpu.memory_space<vmem>>, %arg9: memref<16x128xf32, #tpu.memory_space<vmem>>) attributes {dimension_semantics = [#tpu.dimension_semantics<parallel>, #tpu.dimension_semantics<parallel>, #tpu.dimension_semantics<arbitrary>], iteration_bounds = array<i64: 8, 1, 1>, scalar_prefetch = 0 : i64, scratch_operands = 3 : i64, tpu.core_type = #tpu.core_type<tc>, window_params = [{transform_indices = @transform_0, window_bounds = array<i64: 1, 16, 128>}, {transform_indices = @transform_1, window_bounds = array<i64: 1, 16, 128>}, {transform_indices = @transform_2, window_bounds = array<i64: 1, 16, 128>}, {transform_indices = @transform_3, window_bounds = array<i64: 1, 16, 128>}]} {
    %c0_i32 = arith.constant 0 : i32
    %0 = arith.cmpi eq, %arg2, %c0_i32 : i32
    %1 = arith.extui %0 : i1 to i32
    %c0_i32_0 = arith.constant 0 : i32
    %2 = arith.cmpi ne, %1, %c0_i32_0 : i32
    scf.if %2 {
      %cst_27 = arith.constant 0xFF800000 : f32
      %42 = vector.broadcast %cst_27 : f32 to vector<16x128xf32>
      %c0_28 = arith.constant 0 : index
      %c0_29 = arith.constant 0 : index
      %43 = vector.load %arg7[%c0_28, %c0_29] : memref<16x128xf32, #tpu.memory_space<vmem>>, vector<16x128xf32>
      tpu.vector_store %arg7[%c0_28, %c0_29], %42 {strides = array<i32>} : memref<16x128xf32, #tpu.memory_space<vmem>>, vector<16x128xf32>,
      %cst_30 = arith.constant 0.000000e+00 : f32
      %44 = vector.broadcast %cst_30 : f32 to vector<16x128xf32>
      %c0_31 = arith.constant 0 : index
      %c0_32 = arith.constant 0 : index
      %45 = vector.load %arg8[%c0_31, %c0_32] : memref<16x128xf32, #tpu.memory_space<vmem>>, vector<16x128xf32>
      tpu.vector_store %arg8[%c0_31, %c0_32], %44 {strides = array<i32>} : memref<16x128xf32, #tpu.memory_space<vmem>>, vector<16x128xf32>,
      %cst_33 = arith.constant 0.000000e+00 : f32
      %46 = vector.broadcast %cst_33 : f32 to vector<16x128xf32>
      %c0_34 = arith.constant 0 : index
      %c0_35 = arith.constant 0 : index
      %47 = vector.load %arg9[%c0_34, %c0_35] : memref<16x128xf32, #tpu.memory_space<vmem>>, vector<16x128xf32>
      tpu.vector_store %arg9[%c0_34, %c0_35], %46 {strides = array<i32>} : memref<16x128xf32, #tpu.memory_space<vmem>>, vector<16x128xf32>,
    } else {
    }
    %c0 = arith.constant 0 : index
    %c0_1 = arith.constant 0 : index
    %c0_2 = arith.constant 0 : index
    %3 = vector.load %arg3[%c0, %c0_1, %c0_2] : memref<1x16x128xf32, #tpu.memory_space<vmem>>, vector<1x16x128xf32>
    %4 = vector.shape_cast %3 : vector<1x16x128xf32> to vector<16x128xf32>
    %cst = arith.constant 0.176776692 : f32
    %5 = vector.broadcast %cst : f32 to vector<16x128xf32>
    %6 = arith.mulf %4, %5 : vector<16x128xf32>
    %7 = arith.truncf %6 : vector<16x128xf32> to vector<16x128xbf16>
    %c0_3 = arith.constant 0 : index
    %c0_4 = arith.constant 0 : index
    %c0_5 = arith.constant 0 : index
    %8 = vector.load %arg4[%c0_3, %c0_4, %c0_5] : memref<1x16x128xf32, #tpu.memory_space<vmem>>, vector<1x16x128xf32>
    %9 = vector.shape_cast %8 : vector<1x16x128xf32> to vector<16x128xf32>
    %10 = arith.truncf %9 : vector<16x128xf32> to vector<16x128xbf16>
    %c0_6 = arith.constant 0 : index
    %c0_7 = arith.constant 0 : index
    %c0_8 = arith.constant 0 : index
    %11 = vector.load %arg5[%c0_6, %c0_7, %c0_8] : memref<1x16x128xf32, #tpu.memory_space<vmem>>, vector<1x16x128xf32>
    %12 = vector.shape_cast %11 : vector<1x16x128xf32> to vector<16x128xf32>
    %13 = arith.truncf %12 : vector<16x128xf32> to vector<16x128xbf16>
    %cst_9 = arith.constant dense<0.000000e+00> : vector<16x16xf32>
    %14 = tpu.matmul %7, %10, %cst_9 {dimension_numbers = #tpu.dot_dimension_numbers<[1], [1], [0], [0], [0, 0, 1, 0], [], []>} : vector<16x128xbf16>, vector<16x128xbf16>, vector<16x16xf32> -> vector<16x16xf32>
    %c0_10 = arith.constant 0 : index
    %c0_11 = arith.constant 0 : index
    %15 = vector.load %arg7[%c0_10, %c0_11] : memref<16x128xf32, #tpu.memory_space<vmem>>, vector<16x128xf32>
    %c0_12 = arith.constant 0 : index
    %c0_13 = arith.constant 0 : index
    %16 = vector.load %arg8[%c0_12, %c0_13] : memref<16x128xf32, #tpu.memory_space<vmem>>, vector<16x128xf32>
    %cst_14 = arith.constant dense<0xFF800000> : vector<16xf32>
    %17 = vector.multi_reduction <maximumf>, %14, %cst_14 [1] : vector<16x16xf32> to vector<16xf32>
    %18 = vector.shape_cast %17 : vector<16xf32> to vector<16x1xf32>
    %19 = vector.broadcast %18 : vector<16x1xf32> to vector<16x128xf32>
    %20 = arith.maximumf %15, %19 : vector<16x128xf32>
    %21 = arith.subf %15, %20 : vector<16x128xf32>
    %22 = math.exp %21 : vector<16x128xf32>
    %23 = vector.extract_strided_slice %20 {offsets = [0, 0], sizes = [16, 16], strides = [1, 1]} : vector<16x128xf32> to vector<16x16xf32>
    %24 = arith.subf %14, %23 : vector<16x16xf32>
    %25 = math.exp %24 : vector<16x16xf32>
    %26 = arith.mulf %22, %16 : vector<16x128xf32>
    %cst_15 = arith.constant dense<0.000000e+00> : vector<16xf32>
    %27 = vector.multi_reduction <add>, %25, %cst_15 [1] : vector<16x16xf32> to vector<16xf32>
    %28 = vector.shape_cast %27 : vector<16xf32> to vector<16x1xf32>
    %29 = vector.broadcast %28 : vector<16x1xf32> to vector<16x128xf32>
    %30 = arith.addf %26, %29 : vector<16x128xf32>
    %c0_16 = arith.constant 0 : index
    %c0_17 = arith.constant 0 : index
    %31 = vector.load %arg8[%c0_16, %c0_17] : memref<16x128xf32, #tpu.memory_space<vmem>>, vector<16x128xf32>
    tpu.vector_store %arg8[%c0_16, %c0_17], %30 {strides = array<i32>} : memref<16x128xf32, #tpu.memory_space<vmem>>, vector<16x128xf32>,
    %32 = arith.truncf %25 : vector<16x16xf32> to vector<16x16xbf16>
    %cst_18 = arith.constant dense<0.000000e+00> : vector<16x128xf32>
    %33 = tpu.matmul %32, %13, %cst_18 {dimension_numbers = #tpu.dot_dimension_numbers<[1], [0], [0], [1], [0, 0, 1, 1], [], []>} : vector<16x16xbf16>, vector<16x128xbf16>, vector<16x128xf32> -> vector<16x128xf32>
    %c0_19 = arith.constant 0 : index
    %c0_20 = arith.constant 0 : index
    %34 = vector.load %arg9[%c0_19, %c0_20] : memref<16x128xf32, #tpu.memory_space<vmem>>, vector<16x128xf32>
    %35 = arith.mulf %34, %22 : vector<16x128xf32>
    %36 = arith.addf %35, %33 : vector<16x128xf32>
    %c0_21 = arith.constant 0 : index
    %c0_22 = arith.constant 0 : index
    %37 = vector.load %arg9[%c0_21, %c0_22] : memref<16x128xf32, #tpu.memory_space<vmem>>, vector<16x128xf32>
    tpu.vector_store %arg9[%c0_21, %c0_22], %36 {strides = array<i32>} : memref<16x128xf32, #tpu.memory_space<vmem>>, vector<16x128xf32>,
    %c0_23 = arith.constant 0 : index
    %c0_24 = arith.constant 0 : index
    %38 = vector.load %arg7[%c0_23, %c0_24] : memref<16x128xf32, #tpu.memory_space<vmem>>, vector<16x128xf32>
    tpu.vector_store %arg7[%c0_23, %c0_24], %20 {strides = array<i32>} : memref<16x128xf32, #tpu.memory_space<vmem>>, vector<16x128xf32>,
    %c0_i32_25 = arith.constant 0 : i32
    %39 = arith.cmpi eq, %arg2, %c0_i32_25 : i32
    %40 = arith.extui %39 : i1 to i32
    %c0_i32_26 = arith.constant 0 : i32
    %41 = arith.cmpi ne, %40, %c0_i32_26 : i32
    scf.if %41 {
      %c0_27 = arith.constant 0 : index
      %c0_28 = arith.constant 0 : index
      %42 = vector.load %arg8[%c0_27, %c0_28] : memref<16x128xf32, #tpu.memory_space<vmem>>, vector<16x128xf32>
      %43 = tpu.reciprocal %42 : vector<16x128xf32> -> vector<16x128xf32>
      %c0_29 = arith.constant 0 : index
      %c0_30 = arith.constant 0 : index
      %44 = vector.load %arg9[%c0_29, %c0_30] : memref<16x128xf32, #tpu.memory_space<vmem>>, vector<16x128xf32>
      %45 = arith.mulf %44, %43 : vector<16x128xf32>
      %c0_31 = arith.constant 0 : index
      %c0_32 = arith.constant 0 : index
      %c0_33 = arith.constant 0 : index
      %46 = vector.load %arg6[%c0_31, %c0_32, %c0_33] : memref<1x16x128xf32, #tpu.memory_space<vmem>>, vector<1x16x128xf32>
      %47 = vector.shape_cast %46 : vector<1x16x128xf32> to vector<16x128xf32>
      %48 = vector.shape_cast %45 : vector<16x128xf32> to vector<1x16x128xf32>
      tpu.vector_store %arg6[%c0_31, %c0_32, %c0_33], %48 {strides = array<i32>} : memref<1x16x128xf32, #tpu.memory_space<vmem>>, vector<1x16x128xf32>,
    } else {
    }
    return
  }
  func.func @transform_0(%arg0: i32, %arg1: i32, %arg2: i32) -> (i32, i32, i32) {
    %c0_i32 = arith.constant 0 : i32
    %c0_i32_0 = arith.constant 0 : i32
    return %arg0, %arg1, %c0_i32 : i32, i32, i32
  }
  func.func @transform_1(%arg0: i32, %arg1: i32, %arg2: i32) -> (i32, i32, i32) {
    %c0_i32 = arith.constant 0 : i32
    %c0_i32_0 = arith.constant 0 : i32
    return %arg0, %arg2, %c0_i32 : i32, i32, i32
  }
  func.func @transform_2(%arg0: i32, %arg1: i32, %arg2: i32) -> (i32, i32, i32) {
    %c0_i32 = arith.constant 0 : i32
    %c0_i32_0 = arith.constant 0 : i32
    return %arg0, %arg2, %c0_i32 : i32, i32, i32
  }
  func.func @transform_3(%arg0: i32, %arg1: i32, %arg2: i32) -> (i32, i32, i32) {
    %c0_i32 = arith.constant 0 : i32
    %c0_i32_0 = arith.constant 0 : i32
    return %arg0, %arg1, %c0_i32 : i32, i32, i32
  }
}

</mosaic_0001>

<bundles_post_ra>
// kernel: tpu_custom_call.1
= control target key start
LH: loop header
LB: loop body
LE: loop exit
PB: predicated region body
PF: predicated region fallthrough
CT: control target
= control target key end

     0   :  { %s1255_s0 = inlined_call_operand.hbm [shape: f32[8,16,128], index: 0, kind: input, shape index: {}]   ;;  %s1256_s1 = inlined_call_operand.hbm [shape: f32[8,16,128], index: 1, kind: input, shape index: {}]   ;;  %s1257_s2 = inlined_call_operand.hbm [shape: f32[8,16,128], index: 2, kind: input, shape index: {}]   ;;  %s1258_s3 = inlined_call_operand.hbm [shape: f32[8,16,128], index: 3, kind: output, shape index: {}]  }
   0x1   :  { %1268 = sst [smem:[#allocation18_spill]] %s1256_s1 }
   0x2   :  { %8 = vsyncpa [#allocation6], 0 }
   0x3   :  { %10 = vsyncpa [#allocation6 + $0x1], 0 }
   0x4   :  { %11 = vsyncpa [#allocation9], 0 }
   0x5   :  { %13 = vsyncpa [#allocation9 + $0x1], 0 }
   0x6   :  { %14 = vsyncpa [#allocation7], 0 }
   0x7   :  { %16 = vsyncpa [#allocation7 + $0x1], 0  ;;  %s968_s12 = smov 0   ;;  %s970_s13 = smov 0  }
   0x8   :  { %s972_s14 = smov 0   ;;  %s974_s15 = smov 0  }
   0x9   :  { %s976_s16 = smov 0   ;;  %s978_s17 = smov 0  }
   0xa LB: > { %1269 = sst [smem:[#allocation15_spill]] %s932_s16  ;;  %s999_s18 = sadd.s32 4294967295, %s936_s17   ;;  %s936_s17 = sphi %s978_s17, %s22_s17   ;;  %s932_s16 = sphi %s976_s16, %s1291_s16   ;;  %s928_s15 = sphi %s974_s15, %s1290_s15   ;;  %s924_s14 = sphi %s972_s14, %s1294_s14   ;;  %s920_s13 = sphi %s970_s13, %s1293_s13   ;;  %s916_s12 = sphi %s968_s12, %s1292_s12  }
   0xb   : > { %s627_s19 = sadd.s32 4294967294, %s936_s17   ;;  %s41_s20 = sadd.s32 1, %s932_s16 }
   0xc   : > { %s50_s21 = sadd.s32 1, %s924_s14  ;;  %p43_p0 = scmp.ge.s32.totalorder %s41_s20, 8 }
   0xd   : > { %p57_p1 = scmp.ne.s32.totalorder %s924_s14, %s920_s13  ;;  %p58_p2 = scmp.eq.s32.totalorder %s936_s17, 0 }
   0xe   : > { %p63_p3 = scmp.ne.s32.totalorder %s920_s13, %s916_s12  ;;  %s1296_s20 = smov (%p43_p0, %s41_s20), 0 }
   0xf   : > { %1270 = sst [smem:[#allocation16_spill]] %s1296_s20  ;;  %p1011_p4 = por %p58_p2, %p57_p1 }
  0x10   : > { %p64_p5 = scmp.eq.s32.totalorder %s999_s18, 0  ;;  %s45_s23 = ssub.s32 %s932_s16, %s1296_s20 }
  0x11   : > { %p145_p6 = scmp.eq.s32.totalorder %s999_s18, 7  ;;  %p48_p7 = scmp.eq.s32.totalorder %s45_s23, 0 }
  0x12   : > { %p1019_p8 = por %p64_p5, %p63_p3  ;;  %p151_p10 = scmp.eq.s32.totalorder %s627_s19, 7 }
  0x13   : > { %p1023_p9 = por %p145_p6, %p57_p1  ;;  %p692_p12 = scmp.lt.s32.totalorder %s936_s17, 8 }
  0x14   : > { %s1272_s24 = scalar_select %p1019_p8, 1, 0 }
  0x15   : > { %s1273_s25 = scalar_select %p1023_p9, 1, 0 }
  0x16   : > { %s1028_s26 = scalar_select %p48_p7, %s924_s14, %s50_s21  }
  0x17   : > { %p1030_p11 = por %p151_p10, %p63_p3  ;;  %s1261_s28 = sand.u32 1, %s924_s14  }
  0x18   : > { %1274 = sst [smem:[#allocation17_spill]] %s1028_s26  ;;  %s1038_s29 = sshll.u32 %s1261_s28, 4 }
  0x19   : > { %s1275_s27 = scalar_select %p1030_p11, 1, 0 }
  0x1a   : > { %s1041_s30 = sshll.u32 %s932_s16, 8  ;;  %p1045_p13 = pnand %p692_p12, %p1011_p4 }
  0x1b   : > { %s194_s5 = sand.u32 1, %s936_s17   ;;  %s1277_s1 = sld [smem:[#allocation18_spill]] }
  0x1c   : > { %s198_s9 = scalar_lea.vmem [#allocation8], %s1038_s29  ;;  %s1061_s11 = scalar_lea.sflag [#allocation9], %s194_s5 }
  0x1d   : > { %s207_s10 = sshll.u32 %s198_s9, 4  ;;  %p1067_p3 = pneg %p1045_p13  ;;  %s1058_s10 = int_to_ptr.vmem [resolvable:$true] %s207_s10 }
  0x21   : > { %s1054_s8 = scalar_lea.hbm %s1277_s1, %s1041_s30  ;;  %s765_s6 = scalar_lea.hbm %s1277_s1, 2048 }
  0x22   : > { %s760_s19 = scalar_lea.hbm %s1054_s8, 256  ;;  %p766_p6 = scmp.lt.u32.totalorder %s1054_s8, %s1277_s1 }
  0x23   : > { %p761_p2 = scmp.ne.s32.totalorder %s1054_s8, %s760_s19  ;;  %p767_p7 = scmp.lt.u32.totalorder %s765_s6, %s760_s19 }
  0x24   : > { %p769_p12 = scmp.lt.u32.totalorder %s760_s19, %s1054_s8 }
  0x25   : > { %p763_p4 = pnand %p1067_p3, %p761_p2  ;;  %p768_p10 = por %p767_p7, %p766_p6 }
  0x27   : > { %p764_p5 = pneg %p763_p4  ;;  %p770_p0 = por %p769_p12, %p768_p10 }
  0x29   : > { %p771_p1 = pnand %p770_p0, %p764_p5 }
  0x2b   : > { %774 = shalt.err (!%p771_p1)
}
  0x2c   : > { %s775_s5 = scalar_lea.vmem %s1058_s10, 256  ;;  %s938_s22 = smov [#allocation8]  }
  0x2d   : > { %p776_p2 = scmp.ne.s32.totalorder %s1058_s10, %s775_s5  ;;  %s780_s23 = sshll.u32 %s938_s22, 4  ;;  %s781_s23 = int_to_ptr.vmem [resolvable:$false] %s780_s23 }
  0x2e   : > { %s782_s7 = scalar_lea.vmem %s781_s23, 512  ;;  %p783_p9 = scmp.lt.s32.totalorder %s1058_s10, %s781_s23 }
  0x2f   : > { %p778_p4 = pnand %p776_p2, %p1067_p3  ;;  %p784_p8 = scmp.lt.s32.totalorder %s782_s7, %s775_s5 }
  0x31   : > { %p779_p11 = pneg %p778_p4  ;;  %p785_p6 = por %p784_p8, %p783_p9 }
  0x33   : > { %p786_p7 = pnand %p785_p6, %p779_p11 }
  0x35   : > { %789 = shalt.err (!%p786_p7)
}
  0x36   : > { %s1262_s19 = smov 128   ;;  %s1264_s6 = smov 8  }
  0x37   : > { %684 = dma.hbm_to_vmem [thread:$0]  (!%p1045_p13), %s1054_s8, 256, %s1058_s10, %s1061_s11, %s1262_s19, %s1262_s19, %s1264_s6  }
  0x38   : > { %p1279_p8 = scmp.lt.s32.totalorder %s936_s17, 9  ;;  %p1280_p9 = scmp.ge.s32.totalorder %s936_s17, 1 }
  0x39   : > { %s1106_s23 = scalar_lea.hbm %s1255_s0, %s1041_s30  ;;  %s175_s7 = scalar_lea.vmem [#allocation5], %s1038_s29 }
  0x3a   : > { %p1098_p11 = pnand %p1280_p9, %p1279_p8  ;;  %s184_s28 = sshll.u32 %s175_s7, 4  ;;  %s1109_s28 = int_to_ptr.vmem [resolvable:$true] %s184_s28 }
  0x3b   : > { %s1115_s19 = scalar_lea.hbm %s1257_s2, %s1041_s30  ;;  %s1282_s6 = sand.u32 1, %s924_s14  }
  0x3c   : > { %s1281_s9 = scalar_select %p1098_p11, 1, 0 }
  0x3d   : > { %s1119_s1 = scalar_lea.sflag [#allocation6], %s1282_s6  ;;  %s790_s20 = scalar_lea.hbm %s1106_s23, 256 }
  0x3e   : > { %p791_p0 = scmp.ne.s32.totalorder %s1106_s23, %s790_s20  ;;  %s795_s16 = scalar_lea.hbm %s1255_s0, 2048 }
  0x3f   : > { %p796_p10 = scmp.lt.u32.totalorder %s1106_s23, %s1255_s0  ;;  %p797_p12 = scmp.lt.u32.totalorder %s795_s16, %s790_s20 }
  0x40   : > { %p793_p1 = pnand %p791_p0, %p1067_p3  ;;  %p799_p4 = scmp.lt.u32.totalorder %s790_s20, %s1106_s23 }
  0x41   : > { %p798_p2 = por %p797_p12, %p796_p10 }
  0x42   : > { %p794_p5 = pneg %p793_p1 }
  0x43   : > { %p800_p6 = por %p799_p4, %p798_p2 }
  0x45   : > { %p801_p7 = pnand %p800_p6, %p794_p5 }
  0x47   : > { %804 = shalt.err (!%p801_p7)
}
  0x48   : > { %s805_s30 = scalar_lea.vmem %s1109_s28, 256  ;;  %s941_s6 = smov [#allocation5]  }
  0x49   : > { %p806_p8 = scmp.ne.s32.totalorder %s1109_s28, %s805_s30  ;;  %s810_s8 = sshll.u32 %s941_s6, 4  ;;  %s811_s8 = int_to_ptr.vmem [resolvable:$false] %s810_s8 }
  0x4a   : > { %s812_s26 = scalar_lea.vmem %s811_s8, 512  ;;  %p813_p1 = scmp.lt.s32.totalorder %s1109_s28, %s811_s8 }
  0x4b   : > { %p808_p9 = pnand %p806_p8, %p1067_p3  ;;  %p814_p11 = scmp.lt.s32.totalorder %s812_s26, %s805_s30 }
  0x4d   : > { %p809_p0 = pneg %p808_p9  ;;  %p815_p10 = por %p814_p11, %p813_p1 }
  0x4f   : > { %p816_p12 = pnand %p815_p10, %p809_p0 }
  0x51   : > { %819 = shalt.err (!%p816_p12)
}
  0x52   : > { %s1283_s16 = smov 8   ;;  %s1284_s20 = smov 128  }
  0x53   : > { %681 = dma.hbm_to_vmem [thread:$0]  (!%p1045_p13), %s1106_s23, 256, %s1109_s28, %s1119_s1, %s1284_s20, %s1284_s20, %s1283_s16  }
  0x54   : > { %s221_s10 = scalar_lea.vmem [#allocation10], %s1038_s29  ;;  %s820_s22 = scalar_lea.hbm %s1115_s19, 256 }
  0x55   : > { %s230_s5 = sshll.u32 %s221_s10, 4  ;;  %p821_p11 = scmp.ne.s32.totalorder %s1115_s19, %s820_s22  ;;  %s1147_s5 = int_to_ptr.vmem [resolvable:$true] %s230_s5 }
  0x56   : > { %s825_s6 = scalar_lea.hbm %s1257_s2, 2048  ;;  %p826_p4 = scmp.lt.u32.totalorder %s1115_s19, %s1257_s2 }
  0x57   : > { %p823_p5 = pnand %p821_p11, %p1067_p3  ;;  %p827_p6 = scmp.lt.u32.totalorder %s825_s6, %s820_s22 }
  0x58   : > { %p829_p8 = scmp.lt.u32.totalorder %s820_s22, %s1115_s19 }
  0x59   : > { %p824_p2 = pneg %p823_p5  ;;  %p828_p7 = por %p827_p6, %p826_p4 }
  0x5b   : > { %p830_p9 = por %p829_p8, %p828_p7 }
  0x5d   : > { %p831_p0 = pnand %p830_p9, %p824_p2 }
  0x5f   : > { %834 = shalt.err (!%p831_p0)
}
  0x60   : > { %s835_s1 = scalar_lea.vmem %s1147_s5, 256  ;;  %s942_s28 = smov [#allocation10]  }
  0x61   : > { %p836_p1 = scmp.ne.s32.totalorder %s1147_s5, %s835_s1  ;;  %s840_s29 = sshll.u32 %s942_s28, 4  ;;  %s841_s29 = int_to_ptr.vmem [resolvable:$false] %s840_s29 }
  0x62   : > { %s842_s23 = scalar_lea.vmem %s841_s29, 512  ;;  %p843_p11 = scmp.lt.s32.totalorder %s1147_s5, %s841_s29 }
  0x63   : > { %p838_p10 = pnand %p836_p1, %p1067_p3  ;;  %p844_p5 = scmp.lt.s32.totalorder %s842_s23, %s835_s1 }
  0x65   : > { %p839_p12 = pneg %p838_p10  ;;  %p845_p4 = por %p844_p5, %p843_p11 }
  0x67   : > { %p846_p6 = pnand %p845_p4, %p839_p12 }
  0x69   : > { %849 = shalt.err (!%p846_p6)
}
  0x6a   : > { %687 = dma.hbm_to_vmem [thread:$0]  (!%p1045_p13), %s1115_s19, 256, %s1147_s5, %s1061_s11, %s1284_s20, %s1284_s20, %s1283_s16  }
  0x6b   : > { %p1285_p3 = scmp.ne.s32.totalorder %s1281_s9, 0 }
  0x6c   : > { %s1177_s21 = sand.u32 (!%p1285_p3), 1, %s920_s13   ;;  %p1286_p2 = scmp.ne.s32.totalorder (!%p1285_p3), %s1272_s24, 0 }
  0x6d   : > { %242 = sbr.rel (%p1285_p3) target bundleno = 739 (0x2e3), region = 32  ;;  %s1180_s10 = sshll.u32 (!%p1285_p3), %s1177_s21, 4 }
  0x6e   : > { %s245_s4 = scalar_lea.sflag (!%p1285_p3), [#allocation6], %s1177_s21  ;;  %s248_s22 = scalar_lea.vmem (!%p1285_p3), [#allocation5], %s1180_s10 }
  0x74   : > { %903 = dma.done.wait (%p1286_p2), %s245_s4, 256  }
  0x75   : > { %905 = vsyncadd (%p1286_p2), %s245_s4, 4294967040  ;;  %s253_s11 = sand.u32 1, %s999_s18   ;;  %s257_s9 = scalar_lea.vmem [#allocation8], %s1180_s10 }
  0x76   : > { %s254_s19 = scalar_lea.sflag [#allocation9], %s253_s11 }
  0x77   : > { %907 = dma.done.wait (%p1286_p2), %s254_s19, 512  }
  0x78   : > { %909 = vsyncadd (%p1286_p2), %s254_s19, 4294966784  ;;  %v943_v0 = vmov 0.0   ;;  %vm944_vm0 = vmmov 0   ;;  %v319_v1 = vld [vmem:[%s257_s9] sm:$0xff]  ;;  %v320_v2 = vld [vmem:[%s257_s9 + $0x8] sm:$0xff]  ;;  %vm370_vm1 = vcmask 130048  }
  0x79   : > { %658 = vmatprep.subr.bf16.mxu0 %v943_v0  ;;  %660 = vmatprep.mubr.msk.bf16.mxu0 %vm944_vm0, %v943_v0  ;;  %v314_v3 = vld [vmem:[%s248_s22] sm:$0xff]  ;;  %v321_v4 = vpack.c.bf16 %v320_v2, %v319_v1  ;;  %v315_v5 = vld [vmem:[%s248_s22 + $0x8] sm:$0xff]  ;;  %s266_s18 = scalar_lea.vmem [#allocation10], %s1180_s10  ;;  %s298_s24 = scalar_lea.vmem [#allocation11], %s1180_s10 }
  0x7a   : > { %664 = vmatprep.subr.bf16.mxu1 %v943_v0  ;;  %666 = vmatprep.mubr.msk.bf16.mxu1 %vm944_vm0, %v943_v0  ;;  %v316_v6 = vmul.f32 0.17677669, %v314_v3  ;;  %v317_v7 = vmul.f32 0.17677669, %v315_v5  ;;  %v322_v15 = vld [vmem:[%s266_s18] sm:$0xff]  ;;  %v323_v16 = vld [vmem:[%s266_s18 + $0x8] sm:$0xff] }
  0x7b   : > { %659 = vmatpush3.bf16.xpose.msra.mxu0 %v321_v4  ;;  %v324_v17 = vpack.c.bf16 %v323_v16, %v322_v15  ;;  %s487_s16 = sshll.u32 %s298_s24, 4  ;;  %s653_s20 = sshll.u32 %s928_s15, 8  ;;  %s1202_s16 = int_to_ptr.vmem [resolvable:$true] %s487_s16 }
  0x7c   : > { %v318_v8 = vpack.c.bf16 %v317_v7, %v316_v6  ;;  %s1207_s30 = scalar_lea.hbm %s1258_s3, %s653_s20  ;;  %s472_s15 = scalar_lea.sflag [#allocation7], %s1177_s21 }
  0x7d   : > { %665 = vmatpush3.bf16.msra.mxu1 %v324_v17  ;;  %s850_s6 = scalar_lea.vmem %s1202_s16, 256  ;;  %p1287_p7 = scmp.ne.s32.totalorder %s1273_s25, 0 }
  0x7e   : > { %p851_p13 = scmp.ne.s32.totalorder %s1202_s16, %s850_s6  ;;  %s945_s8 = smov [#allocation11]  }
  0x7f   : > { %s854_s26 = sshll.u32 %s945_s8, 4  ;;  %s855_s26 = int_to_ptr.vmem [resolvable:$false] %s854_s26 }
  0x80   : > { %p852_p8 = pnand %p851_p13, %p1287_p7  ;;  %s856_s1 = scalar_lea.vmem %s855_s26, 512 }
  0x81   : > { %p857_p0 = scmp.lt.s32.totalorder %s1202_s16, %s855_s26  ;;  %p858_p1 = scmp.lt.s32.totalorder %s856_s1, %s850_s6 }
  0x82   : > { %661 = vmatmul.mubr.bf16.vlgmr.msra.gmra.mrb[0].mxu0 %v318_v8  ;;  %p853_p9 = pneg %p852_p8 }
  0x83   : > { %p859_p10 = por %p858_p1, %p857_p0 }
  0x85   : > { %p860_p12 = pnand %p859_p10, %p853_p9 }
 0x155   : > { %v359_v9 = vpop.f32.mrb[0].mxu0 }
 0x156   : > { %v662_v10 = vpop.f32.mrb[1].mxu0  ;;  %v371_v11 = vsel %vm370_vm1, %v359_v9, -inf }
 0x157   : > { %372 = vmax.xlane.f32.xlu0 %v371_v11  ;;  %v362_v12 = vpop.f32.mrb[2].mxu0 }
 0x158   : > { %v663_v13 = vpop.f32.mrb[3].mxu0  ;;  %v374_v14 = vsel %vm370_vm1, %v362_v12, -inf }
 0x15b   : > { %375 = vmax.xlane.f32.xlu0 %v374_v14 }
 0x1e4   : > { %v373_v18 = vpop.xlane.xlu0 %372 }
 0x1e5   : > { %v385_v19 = vsub.f32 %v359_v9, %v373_v18  ;;  %v379_v29 = vsub.f32 -inf, %v373_v18 }
 0x1e7   : > { %v387_v20 = vmul.f32 1.442695, %v385_v19  ;;  %v381_v31 = vmul.f32 1.442695, %v379_v29 }
 0x1e8   : > { %v376_v21 = vpop.xlane.xlu0 %375 }
 0x1e9   : > { %v386_v22 = vsub.f32 %v362_v12, %v376_v21  ;;  %748 = vpow2.f32 %v387_v20  ;;  %v380_v30 = vsub.f32 -inf, %v376_v21 }
 0x1eb   : > { %v389_v23 = vmul.f32 1.442695, %v386_v22  ;;  %v383_v32 = vmul.f32 1.442695, %v380_v30 }
 0x1ed   : > { %750 = vpow2.f32 %v389_v23 }
 0x1ee   : > { %752 = vpow2.f32 %v381_v31 }
 0x1ef   : > { %754 = vpow2.f32 %v383_v32 }
 0x1f3   : > { %v749_v24 = vpop.eup %748 }
 0x1f4   : > { %v393_v25 = vsel %vm370_vm1, %v749_v24, 0.0 }
 0x1f5   : > { %394 = vadd.xlane.f32.xlu1 %v393_v25 }
 0x1f7   : > { %v751_v26 = vpop.eup %750 }
 0x1f8   : > { %v396_v27 = vsel %vm370_vm1, %v751_v26, 0.0  ;;  %v403_v28 = vpack.c.bf16 %v751_v26, %v749_v24  ;;  %v753_v34 = vpop.eup %752 }
 0x1f9   : > { %397 = vadd.xlane.f32.xlu1 %v396_v27  ;;  %v755_v35 = vpop.eup %754  ;;  %v391_v36 = vmul.f32 0.0, %v753_v34 }
 0x1fa   : > { %667 = vmatmul.mubr.msk.bf16.vlgmr.msra.gmra.mrb[0].mxu1 %vm370_vm1, %v403_v28  ;;  %v392_v39 = vmul.f32 0.0, %v755_v35 }
 0x282   : > { %v395_v33 = vpop.xlane.xlu1 %394 }
 0x283   : > { %v399_v38 = vadd.f32 %v395_v33, %v391_v36 }
 0x285   : > { %756 = vrcp.f32 %v399_v38 }
 0x286   : > { %v398_v37 = vpop.xlane.xlu1 %397 }
 0x287   : > { %v400_v40 = vadd.f32 %v398_v37, %v392_v39 }
 0x289   : > { %758 = vrcp.f32 %v400_v40 }
 0x28f   : > { %v757_v44 = vpop.eup %756 }
 0x293   : > { %v759_v49 = vpop.eup %758 }
 0x2cd   : > { %v441_v41 = vpop.f32.mrb[0].mxu1 }
 0x2ce   : > { %v452_v42 = vadd.f32 %v441_v41, %v391_v36  ;;  %v668_v43 = vpop.f32.mrb[1].mxu1 }
 0x2cf   : > { %v444_v45 = vpop.f32.mrb[2].mxu1 }
 0x2d0   : > { %v467_v46 = vmul.f32 %v757_v44, %v452_v42  ;;  %v453_v47 = vadd.f32 %v444_v45, %v392_v39  ;;  %v669_v48 = vpop.f32.mrb[3].mxu1 }
 0x2d2   : > { %469 = vst [vmem:[%s298_s24] sm:$0xff] %v467_v46  ;;  %v468_v50 = vmul.f32 %v759_v49, %v453_v47 }
 0x2d4   : > { %470 = vst [vmem:[%s298_s24 + $0x8] sm:$0xff] %v468_v50 }
 0x2d5   : > { %863 = shalt.err (!%p860_p12)
}
 0x2d6   : > { %s864_s28 = scalar_lea.hbm %s1207_s30, 256  ;;  %s868_s10 = scalar_lea.hbm %s1258_s3, 2048 }
 0x2d7   : > { %p865_p11 = scmp.ne.s32.totalorder %s1207_s30, %s864_s28  ;;  %p869_p6 = scmp.lt.u32.totalorder %s1207_s30, %s1258_s3 }
 0x2d8   : > { %p870_p3 = scmp.lt.u32.totalorder %s868_s10, %s864_s28  ;;  %p872_p13 = scmp.lt.u32.totalorder %s864_s28, %s1207_s30 }
 0x2d9   : > { %p866_p5 = pnand %p865_p11, %p1287_p7 }
 0x2da   : > { %p871_p2 = por %p870_p3, %p869_p6 }
 0x2db   : > { %p867_p4 = pneg %p866_p5 }
 0x2dc   : > { %p873_p8 = por %p872_p13, %p871_p2 }
 0x2de   : > { %p874_p9 = pnand %p873_p8, %p867_p4 }
 0x2e0   : > { %877 = shalt.err (!%p874_p9)
}
 0x2e1   : > { %s946_s11 = smov 128   ;;  %s947_s19 = smov 8  }
 0x2e2   : > { %676 = dma.vmem_to_hbm [thread:$0]  (%p1287_p7), %s1202_s16, 256, %s1207_s30, %s472_s15, %s946_s11, %s946_s11, %s947_s19  }
 0x2e3 PF: > { %p693_p0 = scmp.ge.s32.totalorder %s936_s17, 2  ;;  %s502_s9 = sand.u32 1, %s916_s12  }
 0x2e4   : > { %p1288_p1 = scmp.ne.s32.totalorder %s1275_s27, 0  ;;  %s503_s18 = scalar_lea.sflag [#allocation7], %s502_s9 }
 0x2e6   : > { %p689_p10 = pnand %p693_p0, %p1288_p1 }
 0x2e8   : > { %911 = dma.done.wait (!%p689_p10), %s503_s18, 256  }
 0x2e9   : > { %913 = vsyncadd (!%p689_p10), %s503_s18, 4294967040  ;;  %s22_s17 = sadd.s32 1, %s936_s17   ;;  %s1289_s24 = sld [smem:[#allocation17_spill]] }
 0x2ea   : > { %p19_p12 = scmp.ge.s32.totalorder %s22_s17, 10   ;;  %s1290_s15 = sld [smem:[#allocation15_spill]] }
 0x2eb   : > { %s1291_s16 = sld [smem:[#allocation16_spill]]  ;;  %s1292_s12 = smov %s920_s13 }
 0x2ec   : > { %s1293_s13 = smov %s924_s14  ;;  %21 = sbr.rel (!%p19_p12) target bundleno = 10 (0xa), region = 109 }
 0x2ef   : > { %s1294_s14 = smov %s1289_s24 }
 0x2f3   :  { %508 = vsyncpa [#allocation6], 1 }
 0x2f4   :  { %510 = vsyncpa [#allocation6 + $0x1], 1 }
 0x2f5   :  { %511 = vsyncpa [#allocation9], 1 }
 0x2f6   :  { %513 = vsyncpa [#allocation9 + $0x1], 1 }
 0x2f7   :  { %514 = vsyncpa [#allocation7], 1 }
 0x2f8   :  { %516 = vsyncpa [#allocation7 + $0x1], 1 }

</bundles_post_ra>
